<compile_context>
chip_gen: v5e
topology: v5e:2x2
jax: 0.10.0
libtpu: 0.0.40
codegen_flags: <defaults>
</compile_context>

<pallas_src>
import functools

import jax
import jax.numpy as jnp
from jax.experimental import pallas as pl
from jax.experimental.pallas import tpu as pltpu

BN_EPS = 1e-5
# 32 MiB scoped VMEM: raises v5e's 16 MiB default, stays inside v7x's 64 MiB.
VMEM_LIMIT = 32 * 1024 * 1024


def _round_up(x, m):
    return (x + m - 1) // m * m


# ---------------------------------------------------------------- tile picks
def _pick_tn(Np, m_blocks):
    # Wide lane-dense output tiles, but keep >=2 parallel blocks so a
    # 2-TensorCore chip (v7x megacore) is not idled on the deep layers.
    for tn in (512, 256, 128):
        if Np % tn == 0 and m_blocks * (Np // tn) >= 2:
            return tn
    return 128


def _pick_tk(Kp, TM, TN):
    # Single k-step (TK = full K) whenever the double-buffered LHS/RHS blocks
    # stay comfortably inside VMEM: removes per-k-step pipeline overhead and
    # the f32 accumulator read-modify-write that dominated the deep 1x1 convs.
    if 2 * (TM * Kp + Kp * TN) * 2 <= 12 * 1024 * 1024:
        return Kp
    for cand in range(min(Kp, 2048), 127, -128):
        if Kp % cand == 0:
            return cand
    return 128


# ----------------------------------------------------------------------------
# Fused matmul kernel:  O = act( (P @ W) + bias [+ residual] )
# (the BatchNorm scale is folded into W at parameter-creation time)
# ----------------------------------------------------------------------------
def _mm_kernel(*refs, relu, has_res):
    if has_res:
        p_ref, w_ref, b_ref, r_ref, o_ref, acc_ref = refs
    else:
        p_ref, w_ref, b_ref, o_ref, acc_ref = refs
        r_ref = None
    k = pl.program_id(2)

    @pl.when(k == 0)
    def _():
        acc_ref[...] = jnp.zeros_like(acc_ref)

    acc_ref[...] += jnp.dot(p_ref[...], w_ref[...],
                            preferred_element_type=jnp.float32)

    @pl.when(k == pl.num_programs(2) - 1)
    def _():
        out = acc_ref[...] + b_ref[...]
        if r_ref is not None:
            out = out + r_ref[...].astype(jnp.float32)
        if relu:
            out = jnp.maximum(out, 0.0)
        o_ref[...] = out.astype(o_ref.dtype)


def _fused_matmul(p, w, bias, res, relu, out_dtype):
    # p: (M, K) activations/patches; w: (Kp, Np) pre-padded bf16 weights.
    M, K = p.shape
    Kp, Np = w.shape
    TM = 256 if M >= 256 else _round_up(min(max(M, 1), 128), 8)
    Mp = _round_up(M, TM)
    m_blocks = Mp // TM
    TN = _pick_tn(Np, m_blocks)
    TK = _pick_tk(Kp, TM, TN)
    # With TK == full K for almost every conv there is at most one weight DMA
    # per (i, j) block, so deeper pipeline_mode buffering buys nothing here.

    p = p.astype(jnp.bfloat16)
    if (Mp, Kp) != (M, K):
        p = jnp.pad(p, ((0, Mp - M), (0, Kp - K)))

    in_arrays = [p, w, bias]
    in_specs = [
        pl.BlockSpec((TM, TK), lambda i, j, k: (i, k)),
        pl.BlockSpec((TK, TN), lambda i, j, k: (k, j)),
        pl.BlockSpec((1, TN), lambda i, j, k: (0, j)),
    ]
    has_res = res is not None
    if has_res:
        r = res.astype(jnp.bfloat16)
        if r.shape[0] != Mp:
            r = jnp.pad(r, ((0, Mp - r.shape[0]), (0, 0)))
        in_arrays.append(r)
        in_specs.append(pl.BlockSpec((TM, TN), lambda i, j, k: (i, j)))

    out_bytes = Mp * Np * jnp.dtype(out_dtype).itemsize
    cost = pl.CostEstimate(
        flops=int(2 * Mp * Kp * Np),
        transcendentals=0,
        bytes_accessed=int(Mp * Kp * 2 + Kp * Np * 2 + Np * 4 + out_bytes
                           + (Mp * Np * 2 if has_res else 0)))

    out = pl.pallas_call(
        functools.partial(_mm_kernel, relu=relu, has_res=has_res),
        out_shape=jax.ShapeDtypeStruct((Mp, Np), out_dtype),
        grid_spec=pltpu.PrefetchScalarGridSpec(
            num_scalar_prefetch=0,
            grid=(Mp // TM, Np // TN, Kp // TK),
            in_specs=in_specs,
            out_specs=pl.BlockSpec((TM, TN), lambda i, j, k: (i, j)),
            scratch_shapes=[pltpu.VMEM((TM, TN), jnp.float32)]),
        compiler_params=pltpu.CompilerParams(
            dimension_semantics=("parallel", "parallel", "arbitrary"),
            vmem_limit_bytes=VMEM_LIMIT),
        cost_estimate=cost,
    )(*in_arrays)
    return out[:M] if Mp != M else out


# ----------------------------------------------------------------------------
# Fused 3x3 / stride-1 / pad-1 conv: shifted-window matmul, no im2col in HBM.
# The per-image spatially padded input (flattened to ((H+3)*(W+2), C)) stays in
# VMEM; each of the nine taps is a matmul of a sublane-shifted row window of
# that block against its (C, TN) weight slab.  Two junk columns per output row
# (w = W, W+1) are produced and cropped afterwards.
# ----------------------------------------------------------------------------
def _conv3x3_kernel(x_ref, w_ref, b_ref, o_ref, acc_ref, *, Wp, M, relu):
    k = pl.program_id(2)

    @pl.when(k == 0)
    def _():
        acc_ref[...] = jnp.zeros_like(acc_ref)

    for t in range(9):
        off = (t // 3) * Wp + (t % 3)
        acc_ref[...] += jnp.dot(x_ref[off:off + M, :], w_ref[t],
                                preferred_element_type=jnp.float32)

    @pl.when(k == pl.num_programs(2) - 1)
    def _():
        out = acc_ref[...] + b_ref[...]
        if relu:
            out = jnp.maximum(out, 0.0)
        o_ref[...] = out.astype(o_ref.dtype)


@functools.partial(jax.jit, static_argnames=("relu", "out_dtype"))
def _conv3x3_s1_impl(x, w9, b, *, relu, out_dtype):
    N, H, W, C = x.shape
    Np = w9.shape[-1]
    Wp = W + 2
    HpWp = (H + 3) * Wp      # one extra bottom pad row keeps all taps in-bounds
    M = H * Wp               # output rows per image (incl. 2 junk cols per row)

    xp = jnp.pad(x.astype(jnp.bfloat16), ((0, 0), (1, 2), (1, 1), (0, 0)))
    x2d = xp.reshape(N, HpWp, C)

    TKc = min(C, 1024)
    while C % TKc:
        TKc -= 128
    TN = 128
    for tn in (512, 256, 128):
        if Np % tn == 0 and 9 * TKc * tn * 4 <= 10 * 1024 * 1024:
            TN = tn
            break
    nk = C // TKc

    cost = pl.CostEstimate(
        flops=int(2 * N * M * 9 * C * Np),
        transcendentals=0,
        bytes_accessed=int(x2d.size * 2 + w9.size * 2 + b.size * 4
                           + N * M * Np * jnp.dtype(out_dtype).itemsize))

    out = pl.pallas_call(
        functools.partial(_conv3x3_kernel, Wp=Wp, M=M, relu=relu),
        out_shape=jax.ShapeDtypeStruct((N, M, Np), out_dtype),
        grid_spec=pltpu.PrefetchScalarGridSpec(
            num_scalar_prefetch=0,
            grid=(N, Np // TN, nk),
            in_specs=[
                pl.BlockSpec((None, HpWp, TKc), lambda n, j, k: (n, 0, k)),
                pl.BlockSpec((9, TKc, TN), lambda n, j, k: (0, k, j)),
                pl.BlockSpec((1, TN), lambda n, j, k: (0, j)),
            ],
            out_specs=pl.BlockSpec((None, M, TN), lambda n, j, k: (n, 0, j)),
            scratch_shapes=[pltpu.VMEM((M, TN), jnp.float32)]),
        compiler_params=pltpu.CompilerParams(
            dimension_semantics=("parallel", "parallel", "arbitrary"),
            vmem_limit_bytes=VMEM_LIMIT),
        cost_estimate=cost,
    )(x2d, w9, b)
    # drop the 2 junk columns per row produced by the shifted-window trick
    return out.reshape(N, H, Wp, Np)[:, :, :W, :]


_FUSED3X3 = {"ok": None}


def _fused3x3_supported():
    # One-time lowering probe: if the shifted-window kernel fails to lower on
    # this chip/JAX, fall back to the im2col path for 3x3 stride-1 convs.
    if _FUSED3X3["ok"] is None:
        try:
            x = jnp.zeros((1, 4, 4, 128), jnp.bfloat16)
            w9 = jnp.zeros((9, 128, 128), jnp.bfloat16)
            b = jnp.zeros((1, 128), jnp.float32)
            jax.block_until_ready(
                _conv3x3_s1_impl(x, w9, b, relu=True, out_dtype=jnp.bfloat16))
            _FUSED3X3["ok"] = True
        except Exception:
            _FUSED3X3["ok"] = False
    return _FUSED3X3["ok"]


# ----------------------------------------------------------------------------
# im2col fallback (7x7 stem, the 3 strided 3x3 convs, tiny-spatial 3x3 convs)
# ----------------------------------------------------------------------------
def _im2col(x, kh, kw, stride, pad):
    N, H, W, C = x.shape
    Ho = (H + 2 * pad - kh) // stride + 1
    Wo = (W + 2 * pad - kw) // stride + 1
    xp = jnp.pad(x, ((0, 0), (pad, pad), (pad, pad), (0, 0))) if pad else x
    cols = []
    for i in range(kh):
        for j in range(kw):
            cols.append(xp[:, i:i + Ho * stride:stride,
                           j:j + Wo * stride:stride, :])
    patches = jnp.stack(cols, axis=3)          # (N, Ho, Wo, kh*kw, C)
    return patches.reshape(N * Ho * Wo, kh * kw * C), Ho, Wo


@functools.partial(jax.jit, static_argnames=("stride", "relu", "out_dtype"))
def _conv1x1_impl(x, w, b, res, *, stride, relu, out_dtype):
    N = x.shape[0]
    xs = x if stride == 1 else x[:, ::stride, ::stride, :]
    Ho, Wo = xs.shape[1], xs.shape[2]
    p = xs.reshape(N * Ho * Wo, xs.shape[3])
    r = None if res is None else res.reshape(N * Ho * Wo, res.shape[-1])
    out = _fused_matmul(p, w, b, r, relu, out_dtype)
    return out.reshape(N, Ho, Wo, -1)


@functools.partial(
    jax.jit, static_argnames=("kh", "kw", "stride", "pad", "relu", "out_dtype"))
def _conv_im2col_impl(x, w, b, res, *, kh, kw, stride, pad, relu, out_dtype):
    w2d = w if w.ndim == 2 else w.reshape(-1, w.shape[-1])
    N = x.shape[0]
    p, Ho, Wo = _im2col(x, kh, kw, stride, pad)
    r = None if res is None else res.reshape(N * Ho * Wo, res.shape[-1])
    out = _fused_matmul(p, w2d, b, r, relu, out_dtype)
    return out.reshape(N, Ho, Wo, -1)


def conv2d(x, cp, *, stride=1, pad=0, relu=False, res=None,
           out_dtype=jnp.bfloat16):
    kh, kw = cp["kh"], cp["kw"]
    if kh == 1 and kw == 1:
        return _conv1x1_impl(x, cp["w"], cp["b"], res,
                             stride=stride, relu=relu, out_dtype=out_dtype)
    N, H, W, C = x.shape
    fits_vmem = (H + 3) * (W + 2) * min(C, 1024) * 4 <= 8 * 1024 * 1024
    if (kh == 3 and kw == 3 and stride == 1 and pad == 1 and res is None
            and min(H, W) >= 2 and fits_vmem and _fused3x3_supported()):
        return _conv3x3_s1_impl(x, cp["w"], cp["b"],
                                relu=relu, out_dtype=out_dtype)
    return _conv_im2col_impl(x, cp["w"], cp["b"], res,
                             kh=kh, kw=kw, stride=stride, pad=pad,
                             relu=relu, out_dtype=out_dtype)


# ----------------------------------------------------------------------------
# MaxPool 3x3, stride 2, pad 1 (gridded Pallas max-reduction over the 9 taps;
# lane-dense now that the stem output carries 128 channels).
# TODO(synk): fold the 9-tap window construction into the kernel with a halo
# block to avoid the 9x HBM expansion of the stacked taps.
# ----------------------------------------------------------------------------
def _maxpool_kernel(p_ref, o_ref):
    o_ref[...] = jnp.max(p_ref[...], axis=0)


@jax.jit
def maxpool_3x3_s2(x):
    N, H, W, C = x.shape
    k, s, pad = 3, 2, 1
    Ho = (H + 2 * pad - k) // s + 1
    Wo = (W + 2 * pad - k) // s + 1
    xp = jnp.pad(x, ((0, 0), (pad, pad), (pad, pad), (0, 0)),
                 constant_values=-jnp.inf)
    taps = [xp[:, i:i + Ho * s:s, j:j + Wo * s:s, :]
            for i in range(k) for j in range(k)]
    M = N * Ho * Wo
    p = jnp.stack(taps, axis=0).reshape(k * k, M, C)
    TMr = min(512, _round_up(M, 8))
    Mp = _round_up(M, TMr)
    if Mp != M:
        p = jnp.pad(p, ((0, 0), (0, Mp - M), (0, 0)),
                    constant_values=-jnp.inf)
    out = pl.pallas_call(
        _maxpool_kernel,
        out_shape=jax.ShapeDtypeStruct((Mp, C), x.dtype),
        grid_spec=pltpu.PrefetchScalarGridSpec(
            num_scalar_prefetch=0,
            grid=(Mp // TMr,),
            in_specs=[pl.BlockSpec((k * k, TMr, C), lambda i: (0, i, 0))],
            out_specs=pl.BlockSpec((TMr, C), lambda i: (i, 0))),
        compiler_params=pltpu.CompilerParams(
            dimension_semantics=("parallel",),
            vmem_limit_bytes=VMEM_LIMIT),
    )(p)
    return out[:M].reshape(N, Ho, Wo, C)


# ----------------------------------------------------------------------------
# Fused nearest-2x upsample (+ optional skip add).  Output/skip are viewed as
# (N, H, 2, W, 2C): the W-duplication is a lane-aligned [low | low] concat and
# the H-duplication a broadcast over the size-2 leading dim; several low-res
# rows are processed per grid step.
# ----------------------------------------------------------------------------
def _ups_add_kernel(low_ref, skip_ref, o_ref):
    l = low_ref[...]                                  # (TH, W, C)
    d = jnp.concatenate([l, l], axis=-1)              # (TH, W, 2C)
    o_ref[...] = d[:, None, :, :] + skip_ref[...]     # broadcast row duplication


def _ups_kernel(low_ref, o_ref):
    l = low_ref[...]
    d = jnp.concatenate([l, l], axis=-1)
    o_ref[...] = jnp.broadcast_to(d[:, None, :, :], o_ref.shape).astype(
        o_ref.dtype)


def _pick_th(H, W, C2):
    best = 1
    for th in range(1, H + 1):
        if H % th == 0 and th * 2 * W * C2 * 2 <= 2 * 1024 * 1024:
            best = th
    return best


@jax.jit
def upsample2x_add(low, skip):
    N, H, W, C = low.shape
    skip_v = skip.reshape(N, H, 2, W, 2 * C)
    TH = _pick_th(H, W, 2 * C)
    out = pl.pallas_call(
        _ups_add_kernel,
        out_shape=jax.ShapeDtypeStruct((N, H, 2, W, 2 * C), low.dtype),
        grid_spec=pltpu.PrefetchScalarGridSpec(
            num_scalar_prefetch=0,
            grid=(N, H // TH),
            in_specs=[
                pl.BlockSpec((None, TH, W, C), lambda n, h: (n, h, 0, 0)),
                pl.BlockSpec((None, TH, 2, W, 2 * C),
                             lambda n, h: (n, h, 0, 0, 0)),
            ],
            out_specs=pl.BlockSpec((None, TH, 2, W, 2 * C),
                                   lambda n, h: (n, h, 0, 0, 0))),
        compiler_params=pltpu.CompilerParams(
            dimension_semantics=("parallel", "parallel"),
            vmem_limit_bytes=VMEM_LIMIT),
    )(low, skip_v)
    return out.reshape(N, 2 * H, 2 * W, C)


@jax.jit
def upsample2x(x):
    N, H, W, C = x.shape
    TH = _pick_th(H, W, 2 * C)
    out = pl.pallas_call(
        _ups_kernel,
        out_shape=jax.ShapeDtypeStruct((N, H, 2, W, 2 * C), x.dtype),
        grid_spec=pltpu.PrefetchScalarGridSpec(
            num_scalar_prefetch=0,
            grid=(N, H // TH),
            in_specs=[pl.BlockSpec((None, TH, W, C), lambda n, h: (n, h, 0, 0))],
            out_specs=pl.BlockSpec((None, TH, 2, W, 2 * C),
                                   lambda n, h: (n, h, 0, 0, 0))),
        compiler_params=pltpu.CompilerParams(
            dimension_semantics=("parallel", "parallel"),
            vmem_limit_bytes=VMEM_LIMIT),
    )(x)
    return out.reshape(N, 2 * H, 2 * W, C)


# ----------------------------------------------------------------------------
# Parameters (deterministic, synthetic init; eval-mode BN folded into weights).
# Input channels are zero-padded to multiples of 128 inside the weights so the
# lane-padded activations can be carried through the whole network.
# ----------------------------------------------------------------------------
class KeyGen:
    def __init__(self, key):
        self.key = key
        self.i = 0

    def next(self):
        self.i += 1
        return jax.random.fold_in(self.key, self.i)


def _prep_conv(key, kh, kw, cin, cout, *, bn=True, bias_key=None,
               pad_cin=True):
    fan_in = kh * kw * cin
    std = (1.0 / fan_in) ** 0.5
    w = jax.random.normal(key, (kh, kw, cin, cout), jnp.float32) * std
    if bn:
        # eval-mode BatchNorm with gamma=1, beta=0, mean=0, var=1 folded in.
        w = w * (1.0 / (1.0 + BN_EPS) ** 0.5)
        b = jnp.zeros((cout,), jnp.float32)
    else:
        b = jax.random.uniform(bias_key, (cout,), jnp.float32, -1.0, 1.0) \
            / (fan_in ** 0.5)
    Npad = _round_up(cout, 128)
    if pad_cin:
        Cp = _round_up(cin, 128)
        w = jnp.pad(w, ((0, 0), (0, 0), (0, Cp - cin), (0, Npad - cout)))
        w = w.reshape(Cp, Npad) if kh == 1 and kw == 1 \
            else w.reshape(kh * kw, Cp, Npad)
    else:
        # stem: keep raw cin, flatten (tap-major, cin) and pad K to 128-mult
        K = kh * kw * cin
        w = w.reshape(K, cout)
        Kp = _round_up(K, 128)
        w = jnp.pad(w, ((0, Kp - K), (0, Npad - cout)))
    w = w.astype(jnp.bfloat16)
    b = jnp.pad(b.reshape(1, -1), ((0, 0), (0, Npad - cout)))
    return {"w": w, "b": b, "kh": kh, "kw": kw, "cout": cout}


def make_params(kg):
    params = {"stem": _prep_conv(kg.next(), 7, 7, 3, 64, pad_cin=False)}
    layers_cfg = [(64, 3, 1), (128, 8, 2), (256, 36, 2), (512, 3, 2)]
    in_ch = 64
    layers = []
    for planes, nblocks, stride in layers_cfg:
        blocks = []
        for bidx in range(nblocks):
            s = stride if bidx == 0 else 1
            blk = {
                "c1": _prep_conv(kg.next(), 1, 1, in_ch, planes),
                "c2": _prep_conv(kg.next(), 3, 3, planes, planes),
                "c3": _prep_conv(kg.next(), 1, 1, planes, planes * 4),
                "stride": s,
            }
            if bidx == 0 and (s != 1 or in_ch != planes * 4):
                blk["cd"] = _prep_conv(kg.next(), 1, 1, in_ch, planes * 4)
            blocks.append(blk)
            in_ch = planes * 4
        layers.append(blocks)
    params["layers"] = layers

    dec_cfgs = [(2048, 1024), (1024, 512), (512, 256),
                (256, 128), (128, 64), (64, 1)]
    params["decoder"] = [
        _prep_conv(kg.next(), 3, 3, cin, cout, bn=False, bias_key=kg.next())
        for cin, cout in dec_cfgs]
    return params


# ----------------------------------------------------------------------------
# Forward pass
# ----------------------------------------------------------------------------
def bottleneck(x, blk):
    s = blk["stride"]
    if "cd" in blk:
        identity = conv2d(x, blk["cd"], stride=s, pad=0, relu=False)
    else:
        identity = x
    out = conv2d(x, blk["c1"], stride=1, pad=0, relu=True)
    out = conv2d(out, blk["c2"], stride=s, pad=1, relu=True)
    # conv3 + bn3 + residual-add + relu fused in one Pallas kernel epilogue
    out = conv2d(out, blk["c3"], stride=1, pad=0, relu=True, res=identity)
    return out


def resnet152_unet_forward(x_nchw, params):
    x = jnp.transpose(x_nchw, (0, 2, 3, 1)).astype(jnp.bfloat16)  # NCHW->NHWC
    # stem: conv1 7x7/2 + bn1 + relu + maxpool 3x3/2
    x = conv2d(x, params["stem"], stride=2, pad=3, relu=True)
    x = maxpool_3x3_s2(x)
    feats = []
    for layer in params["layers"]:
        for blk in layer:
            x = bottleneck(x, blk)
        feats.append(x)
    x1, x2, x3, x4 = feats

    dec = params["decoder"]
    x = upsample2x_add(conv2d(x4, dec[0], stride=1, pad=1, relu=True), x3)
    x = upsample2x_add(conv2d(x, dec[1], stride=1, pad=1, relu=True), x2)
    x = upsample2x_add(conv2d(x, dec[2], stride=1, pad=1, relu=True), x1)
    x = upsample2x(conv2d(x, dec[3], stride=1, pad=1, relu=True))
    x = upsample2x(conv2d(x, dec[4], stride=1, pad=1, relu=True))
    x = conv2d(x, dec[5], stride=1, pad=1, relu=False, out_dtype=jnp.float32)
    x = x[..., :dec[5]["cout"]]                      # drop lane-pad channels
    return jnp.transpose(x, (0, 3, 1, 2))            # NHWC -> NCHW


if __name__ == "__main__":
    key = jax.random.PRNGKey(0)
    kg = KeyGen(key)
    params = make_params(kg)

    # smallest spatial compatible with ResNet's /32 downsampling is 32
    x = jax.random.normal(jax.random.fold_in(key, 12345),
                          (2, 3, 32, 32), jnp.float32)

    y = resnet152_unet_forward(x, params)
    y = jax.block_until_ready(y)
    assert y.shape == (2, 1, 32, 32), y.shape
    assert bool(jnp.all(jnp.isfinite(y)))
    print("KERNEL_OK")
</pallas_src>

<mosaic_0001>
module attributes {stable_mosaic.version = 11 : i64} {
  func.func @_mm_kernel(%arg0: i32, %arg1: i32, %arg2: i32, %arg3: memref<256x256xbf16, #tpu.memory_space<vmem>>, %arg4: memref<256x128xbf16, #tpu.memory_space<vmem>>, %arg5: memref<1x128xf32, #tpu.memory_space<vmem>>, %arg6: memref<256x128xbf16, #tpu.memory_space<vmem>>, %arg7: memref<256x128xf32, #tpu.memory_space<vmem>>) attributes {dimension_semantics = [#tpu.dimension_semantics<parallel>, #tpu.dimension_semantics<parallel>, #tpu.dimension_semantics<arbitrary>], iteration_bounds = array<i64: 2, 1, 1>, scalar_prefetch = 0 : i64, scratch_operands = 1 : i64, tpu.core_type = #tpu.core_type<tc>, window_params = [{transform_indices = @transform_0, window_bounds = array<i64: 256, 256>}, {transform_indices = @transform_1, window_bounds = array<i64: 256, 128>}, {transform_indices = @transform_2, window_bounds = array<i64: 1, 128>}, {transform_indices = @transform_3, window_bounds = array<i64: 256, 128>}]} {
    %c0_i32 = arith.constant 0 : i32
    %0 = arith.cmpi eq, %arg2, %c0_i32 : i32
    %1 = arith.extui %0 : i1 to i32
    %c0_i32_0 = arith.constant 0 : i32
    %2 = arith.cmpi ne, %1, %c0_i32_0 : i32
    scf.if %2 {
      %cst_10 = arith.constant 0.000000e+00 : f32
      %12 = vector.broadcast %cst_10 : f32 to vector<256x128xf32>
      %c0_11 = arith.constant 0 : index
      %c0_12 = arith.constant 0 : index
      %13 = vector.load %arg7[%c0_11, %c0_12] : memref<256x128xf32, #tpu.memory_space<vmem>>, vector<256x128xf32>
      tpu.vector_store %arg7[%c0_11, %c0_12], %12 {strides = array<i32>} : memref<256x128xf32, #tpu.memory_space<vmem>>, vector<256x128xf32>,
    } else {
    }
    %c0 = arith.constant 0 : index
    %c0_1 = arith.constant 0 : index
    %3 = vector.load %arg7[%c0, %c0_1] : memref<256x128xf32, #tpu.memory_space<vmem>>, vector<256x128xf32>
    %c0_2 = arith.constant 0 : index
    %c0_3 = arith.constant 0 : index
    %4 = vector.load %arg3[%c0_2, %c0_3] : memref<256x256xbf16, #tpu.memory_space<vmem>>, vector<256x256xbf16>
    %c0_4 = arith.constant 0 : index
    %c0_5 = arith.constant 0 : index
    %5 = vector.load %arg4[%c0_4, %c0_5] : memref<256x128xbf16, #tpu.memory_space<vmem>>, vector<256x128xbf16>
    %cst = arith.constant dense<0.000000e+00> : vector<256x128xf32>
    %6 = tpu.matmul %4, %5, %cst {dimension_numbers = #tpu.dot_dimension_numbers<[1], [0], [0], [1], [0, 0, 1, 1], [], []>} : vector<256x256xbf16>, vector<256x128xbf16>, vector<256x128xf32> -> vector<256x128xf32>
    %7 = arith.addf %3, %6 : vector<256x128xf32>
    %c0_6 = arith.constant 0 : index
    %c0_7 = arith.constant 0 : index
    %8 = vector.load %arg7[%c0_6, %c0_7] : memref<256x128xf32, #tpu.memory_space<vmem>>, vector<256x128xf32>
    tpu.vector_store %arg7[%c0_6, %c0_7], %7 {strides = array<i32>} : memref<256x128xf32, #tpu.memory_space<vmem>>, vector<256x128xf32>,
    %c0_i32_8 = arith.constant 0 : i32
    %9 = arith.cmpi eq, %arg2, %c0_i32_8 : i32
    %10 = arith.extui %9 : i1 to i32
    %c0_i32_9 = arith.constant 0 : i32
    %11 = arith.cmpi ne, %10, %c0_i32_9 : i32
    scf.if %11 {
      %c0_10 = arith.constant 0 : index
      %c0_11 = arith.constant 0 : index
      %12 = vector.load %arg7[%c0_10, %c0_11] : memref<256x128xf32, #tpu.memory_space<vmem>>, vector<256x128xf32>
      %c0_12 = arith.constant 0 : index
      %c0_13 = arith.constant 0 : index
      %13 = vector.load %arg5[%c0_12, %c0_13] : memref<1x128xf32, #tpu.memory_space<vmem>>, vector<1x128xf32>
      %14 = vector.broadcast %13 : vector<1x128xf32> to vector<256x128xf32>
      %15 = arith.addf %12, %14 : vector<256x128xf32>
      %cst_14 = arith.constant 0.000000e+00 : f32
      %16 = vector.broadcast %cst_14 : f32 to vector<256x128xf32>
      %17 = arith.maximumf %15, %16 : vector<256x128xf32>
      %18 = arith.truncf %17 : vector<256x128xf32> to vector<256x128xbf16>
      %c0_15 = arith.constant 0 : index
      %c0_16 = arith.constant 0 : index
      %19 = vector.load %arg6[%c0_15, %c0_16] : memref<256x128xbf16, #tpu.memory_space<vmem>>, vector<256x128xbf16>
      tpu.vector_store %arg6[%c0_15, %c0_16], %18 {strides = array<i32>} : memref<256x128xbf16, #tpu.memory_space<vmem>>, vector<256x128xbf16>,
    } else {
    }
    return
  }
  func.func @transform_0(%arg0: i32, %arg1: i32, %arg2: i32) -> (i32, i32) {
    %c0_i32 = arith.constant 0 : i32
    return %arg0, %arg2 : i32, i32
  }
  func.func @transform_1(%arg0: i32, %arg1: i32, %arg2: i32) -> (i32, i32) {
    %c0_i32 = arith.constant 0 : i32
    return %arg2, %arg1 : i32, i32
  }
  func.func @transform_2(%arg0: i32, %arg1: i32, %arg2: i32) -> (i32, i32) {
    %c0_i32 = arith.constant 0 : i32
    %c0_i32_0 = arith.constant 0 : i32
    return %c0_i32, %arg1 : i32, i32
  }
  func.func @transform_3(%arg0: i32, %arg1: i32, %arg2: i32) -> (i32, i32) {
    %c0_i32 = arith.constant 0 : i32
    return %arg0, %arg1 : i32, i32
  }
}

</mosaic_0001>

<bundles_post_ra>
// kernel: _conv_im2col_impl.1
= control target key start
LH: loop header
LB: loop body
LE: loop exit
PB: predicated region body
PF: predicated region fallthrough
CT: control target
= control target key end

     0   :  { %8 = vsyncpa [#allocation4], 0  ;;  %s1983_s0 = inlined_call_operand.vmem [shape: bf16[512,256], index: 0, kind: input, shape index: {}]   ;;  %s1984_s1 = inlined_call_operand.vmem [shape: bf16[256,128], index: 1, kind: input, shape index: {}]   ;;  %s1985_s2 = inlined_call_operand.vmem [shape: f32[1,128], index: 2, kind: input, shape index: {}]   ;;  %s1986_s3 = inlined_call_operand.hbm [shape: bf16[512,128], index: 3, kind: output, shape index: {}]  }
   0x1   :  { %10 = vsyncpa [#allocation4 + $0x1], 0  ;;  %s1713_s12 = smov 0   ;;  %s1715_s13 = smov 0  }
   0x2   :  { %s1717_s14 = smov 0   ;;  %s1719_s15 = smov 0  }
   0x3   :  { %s1721_s16 = smov 0   ;;  %s1723_s17 = smov 0  }
   0x4 LB: > { %s1184_s18 = sadd.s32 4294967295, %s1689_s17   ;;  %s1185_s19 = sadd.s32 4294967294, %s1689_s17   ;;  %s1689_s17 = sphi %s1723_s17, %s16_s17   ;;  %s1685_s16 = sphi %s1721_s16, %s1993_s16   ;;  %s1681_s15 = sphi %s1719_s15, %s1992_s15   ;;  %s1677_s14 = sphi %s1717_s14, %s1991_s14   ;;  %s1673_s13 = sphi %s1715_s13, %s1990_s13   ;;  %s1669_s12 = sphi %s1713_s12, %s1989_s12  }
   0x5   : > { %s35_s20 = sadd.s32 1, %s1685_s16  ;;  %s126_s21 = sadd.s32 1, %s1677_s14 }
   0x6   : > { %p37_p0 = scmp.ge.s32.totalorder %s35_s20, 2  ;;  %p136_p1 = scmp.ne.s32.totalorder %s1677_s14, %s1673_s13 }
   0x7   : > { %p137_p2 = scmp.eq.s32.totalorder %s1184_s18, 1  ;;  %p142_p3 = scmp.ne.s32.totalorder %s1673_s13, %s1669_s12 }
   0x8   : > { %s1995_s20 = smov (%p37_p0, %s35_s20), 0  ;;  %p143_p5 = scmp.eq.s32.totalorder %s1185_s19, 1 }
   0x9   : > { %p1753_p4 = por %p137_p2, %p136_p1  ;;  %s121_s23 = ssub.s32 %s1685_s16, %s1995_s20 }
   0xa   : > { %p1190_p6 = scmp.ge.s32.totalorder %s1689_s17, 1  ;;  %p124_p7 = scmp.eq.s32.totalorder %s121_s23, 0 }
   0xb   : > { %p1760_p8 = por %p143_p5, %p142_p3  ;;  %p194_p9 = scmp.lt.s32.totalorder %s1689_s17, 3 }
   0xc   : > { %s1766_s25 = scalar_select %p124_p7, %s1677_s14, %s126_s21  }
   0xd   : > { %p195_p10 = pnand %p1190_p6, %p194_p9 }
   0xe   : > { %s1192_s11 = sshll.u32 (!%p195_p10), %s1681_s15, 5  ;;  %s231_s4 = sand.u32 (!%p195_p10), 1, %s1673_s13  }
   0xf   : > { %198 = sbr.rel (%p195_p10) target bundleno = 317 (0x13d), region = 32  ;;  %p236_p11 = scmp.lt.s32.totalorder (!%p195_p10), %s1192_s11, 63 }
  0x10   : > { %s1191_s5 = sshll.u32 (!%p195_p10), %s231_s4, 7  ;;  %s1631_s27 = scalar_lea.hbm (!%p195_p10), %s1986_s3, 256 }
  0x11   : > { %s1897_s6 = scalar_lea.vmem (!%p195_p10), [#allocation3], %s1191_s5 }
  0x12   : > { %s1070_s18 = sshll.u32 (!%p195_p10), %s1897_s6, 4  ;;  %s1071_s18 = int_to_ptr.vmem [resolvable:$true] %s1070_s18 }
  0x14   : > { %v1432_v0 = vld [vmem:[%s1984_s1 + $0x38] sm:$0xff]  ;;  %v1431_v2 = vld [vmem:[%s1984_s1 + $0x30] sm:$0xff]  ;;  %v1430_v4 = vld [vmem:[%s1984_s1 + $0x28] sm:$0xff]  ;;  %s1997_s11 = smov (!%p236_p11, %s1192_s11), 63 }
  0x15   : > { %v1440_v1 = vld [vmem:[%s1984_s1 + $0x78] sm:$0xff]  ;;  %647 = vmatpush.bf16.msra.mxu0 %v1432_v0  ;;  %1537 = vmatpush.bf16.msra.mxu2 %v1432_v0  ;;  %v1439_v3 = vld [vmem:[%s1984_s1 + $0x70] sm:$0xff]  ;;  %v1438_v5 = vld [vmem:[%s1984_s1 + $0x68] sm:$0xff]  ;;  %s1392_s7 = sshll.u32 %s1997_s11, 3 }
  0x16   : > { %736 = vmatpush.bf16.msra.mxu1 %v1440_v1  ;;  %1545 = vmatpush.bf16.msra.mxu3 %v1440_v1  ;;  %v1429_v6 = vld [vmem:[%s1984_s1 + $0x20] sm:$0xff]  ;;  %v1428_v8 = vld [vmem:[%s1984_s1 + $0x18] sm:$0xff]  ;;  %v1427_v10 = vld [vmem:[%s1984_s1 + $0x10] sm:$0xff]  ;;  %s1811_s19 = scalar_lea.vmem %s1983_s0, %s1392_s7  ;;  %s1441_s7 = sshll.u32 %s1681_s15, 7 }
  0x17   : > { %v1437_v7 = vld [vmem:[%s1984_s1 + $0x60] sm:$0xff]  ;;  %v1436_v9 = vld [vmem:[%s1984_s1 + $0x58] sm:$0xff]  ;;  %v1435_v11 = vld [vmem:[%s1984_s1 + $0x50] sm:$0xff]  ;;  %s1069_s10 = scalar_lea.hbm %s1986_s3, %s1441_s7 }
  0x18   : > { %v1426_v12 = vld [vmem:[%s1984_s1 + $0x8] sm:$0xff]  ;;  %v1425_v14 = vld [vmem:[%s1984_s1] sm:$0xff]  ;;  %v1205_v28 = vld [vmem:[%s1811_s19 + $0x10] sm:$0xf]  ;;  %s1072_s15 = sshll.u32 %s1069_s10, 4  ;;  %s1073_s15 = int_to_ptr.hbm [resolvable:$true] %s1072_s15 }
  0x19   : > { %648 = vmatpush.bf16.msra.mxu0 %v1431_v2  ;;  %1538 = vmatpush.bf16.msra.mxu2 %v1431_v2  ;;  %v1434_v13 = vld [vmem:[%s1984_s1 + $0x48] sm:$0xff]  ;;  %v1433_v15 = vld [vmem:[%s1984_s1 + $0x40] sm:$0xff]  ;;  %v1396_v29 = vld [vmem:[%s1811_s19 + $0x14] sm:$0xf0]  ;;  %s1625_s11 = sshra.s32 %s1073_s15, 4  ;;  %s1626_s11 = int_to_ptr.hbm [resolvable:$true] %s1625_s11 }
  0x1a   : > { %737 = vmatpush.bf16.msra.mxu1 %v1439_v3  ;;  %1546 = vmatpush.bf16.msra.mxu3 %v1439_v3  ;;  %v1197_v16 = vld [vmem:[%s1811_s19] sm:$0xf]  ;;  %v1394_v17 = vld [vmem:[%s1811_s19 + $0x4] sm:$0xf0]  ;;  %v1393_v20 = vld [vmem:[%s1811_s19 + $0x4] sm:$0xf]  ;;  %v1206_v36 = vor.u32 %v1396_v29, %v1205_v28  ;;  %p1632_p1 = scmp.lt.s32.totalorder %s1626_s11, %s1986_s3 }
  0x1b   : > { %v1261_v18 = vld [vmem:[%s1811_s19 + $0x80] sm:$0xf]  ;;  %v1410_v19 = vld [vmem:[%s1811_s19 + $0x84] sm:$0xf0]  ;;  %v1199_v21 = vld [vmem:[%s1811_s19 + $0x8] sm:$0xf0]  ;;  %v1198_v24 = vor.u32 %v1394_v17, %v1197_v16 }
  0x1c   : > { %v1409_v22 = vld [vmem:[%s1811_s19 + $0x84] sm:$0xf]  ;;  %v1263_v23 = vld [vmem:[%s1811_s19 + $0x88] sm:$0xf0]  ;;  %v1262_v25 = vor.u32 %v1410_v19, %v1261_v18  ;;  %v1202_v26 = vor.u32 %v1393_v20, %v1199_v21  ;;  %v1269_v30 = vld [vmem:[%s1811_s19 + $0x90] sm:$0xf] }
  0x1d   : > { %649 = vmatpush.bf16.msra.mxu0 %v1430_v4  ;;  %1539 = vmatpush.bf16.msra.mxu2 %v1430_v4  ;;  %v1266_v27 = vor.u32 %v1409_v22, %v1263_v23  ;;  %v1412_v31 = vld [vmem:[%s1811_s19 + $0x94] sm:$0xf0]  ;;  %v1395_v32 = vld [vmem:[%s1811_s19 + $0x14] sm:$0xf]  ;;  %v1207_v33 = vld [vmem:[%s1811_s19 + $0x18] sm:$0xf0] }
  0x1e   : > { %738 = vmatpush.bf16.msra.mxu1 %v1438_v5  ;;  %1547 = vmatpush.bf16.msra.mxu3 %v1438_v5  ;;  %v1411_v34 = vld [vmem:[%s1811_s19 + $0x94] sm:$0xf]  ;;  %v1271_v35 = vld [vmem:[%s1811_s19 + $0x98] sm:$0xf0]  ;;  %v1270_v37 = vor.u32 %v1412_v31, %v1269_v30  ;;  %v1210_v38 = vor.u32 %v1395_v32, %v1207_v33  ;;  %v1213_v40 = vld [vmem:[%s1811_s19 + $0x20] sm:$0xf] }
  0x1f   : > { %v1274_v39 = vor.u32 %v1411_v34, %v1271_v35  ;;  %v1398_v41 = vld [vmem:[%s1811_s19 + $0x24] sm:$0xf0]  ;;  %v1277_v42 = vld [vmem:[%s1811_s19 + $0xa0] sm:$0xf]  ;;  %v1397_v44 = vld [vmem:[%s1811_s19 + $0x24] sm:$0xf] }
  0x20   : > { %v1414_v43 = vld [vmem:[%s1811_s19 + $0xa4] sm:$0xf0]  ;;  %v1215_v45 = vld [vmem:[%s1811_s19 + $0x28] sm:$0xf0]  ;;  %v1413_v46 = vld [vmem:[%s1811_s19 + $0xa4] sm:$0xf]  ;;  %v1214_v48 = vor.u32 %v1398_v41, %v1213_v40 }
  0x21   : > { %650 = vmatpush.bf16.msra.mxu0 %v1429_v6  ;;  %1540 = vmatpush.bf16.msra.mxu2 %v1429_v6  ;;  %v1279_v47 = vld [vmem:[%s1811_s19 + $0xa8] sm:$0xf0]  ;;  %v1278_v49 = vor.u32 %v1414_v43, %v1277_v42  ;;  %v1218_v50 = vor.u32 %v1397_v44, %v1215_v45  ;;  %v1221_v52 = vld [vmem:[%s1811_s19 + $0x30] sm:$0xf]  ;;  %v1400_v53 = vld [vmem:[%s1811_s19 + $0x34] sm:$0xf0] }
  0x22   : > { %739 = vmatpush.bf16.msra.mxu1 %v1437_v7  ;;  %1548 = vmatpush.bf16.msra.mxu3 %v1437_v7  ;;  %v1282_v51 = vor.u32 %v1413_v46, %v1279_v47  ;;  %v1285_v54 = vld [vmem:[%s1811_s19 + $0xb0] sm:$0xf]  ;;  %v1416_v55 = vld [vmem:[%s1811_s19 + $0xb4] sm:$0xf0]  ;;  %v1399_v56 = vld [vmem:[%s1811_s19 + $0x34] sm:$0xf]  ;;  %v1222_v60 = vor.u32 %v1400_v53, %v1221_v52 }
  0x23   : > { %v1223_v57 = vld [vmem:[%s1811_s19 + $0x38] sm:$0xf0]  ;;  %v1415_v58 = vld [vmem:[%s1811_s19 + $0xb4] sm:$0xf]  ;;  %v1286_v61 = vor.u32 %v1416_v55, %v1285_v54  ;;  %v1229_v0 = vld [vmem:[%s1811_s19 + $0x40] sm:$0xf] }
  0x24   : > { %v1287_v59 = vld [vmem:[%s1811_s19 + $0xb8] sm:$0xf0]  ;;  %v1226_v62 = vor.u32 %v1399_v56, %v1223_v57  ;;  %v1402_v1 = vld [vmem:[%s1811_s19 + $0x44] sm:$0xf0]  ;;  %v1293_v2 = vld [vmem:[%s1811_s19 + $0xc0] sm:$0xf] }
  0x25   : > { %651 = vmatpush.bf16.msra.mxu0 %v1428_v8  ;;  %1541 = vmatpush.bf16.msra.mxu2 %v1428_v8  ;;  %v1290_v63 = vor.u32 %v1415_v58, %v1287_v59  ;;  %v1418_v3 = vld [vmem:[%s1811_s19 + $0xc4] sm:$0xf0]  ;;  %v1401_v4 = vld [vmem:[%s1811_s19 + $0x44] sm:$0xf]  ;;  %v1231_v5 = vld [vmem:[%s1811_s19 + $0x48] sm:$0xf0]  ;;  %v1230_v8 = vor.u32 %v1402_v1, %v1229_v0 }
  0x26   : > { %740 = vmatpush.bf16.msra.mxu1 %v1436_v9  ;;  %1549 = vmatpush.bf16.msra.mxu3 %v1436_v9  ;;  %v1417_v6 = vld [vmem:[%s1811_s19 + $0xc4] sm:$0xf]  ;;  %v1295_v7 = vld [vmem:[%s1811_s19 + $0xc8] sm:$0xf0]  ;;  %v1294_v9 = vor.u32 %v1418_v3, %v1293_v2  ;;  %v1403_v16 = vld [vmem:[%s1811_s19 + $0x54] sm:$0xf] }
  0x27   : > { %v1239_v17 = vld [vmem:[%s1811_s19 + $0x58] sm:$0xf0]  ;;  %v1419_v18 = vld [vmem:[%s1811_s19 + $0xd4] sm:$0xf]  ;;  %v1405_v28 = vld [vmem:[%s1811_s19 + $0x64] sm:$0xf] }
  0x28   : > { %v1303_v19 = vld [vmem:[%s1811_s19 + $0xd8] sm:$0xf0]  ;;  %v1242_v22 = vor.u32 %v1403_v16, %v1239_v17  ;;  %v1247_v29 = vld [vmem:[%s1811_s19 + $0x68] sm:$0xf0]  ;;  %v1421_v30 = vld [vmem:[%s1811_s19 + $0xe4] sm:$0xf] }
  0x29   : > { %652 = vmatpush.bf16.msra.mxu0 %v1427_v10  ;;  %1542 = vmatpush.bf16.msra.mxu2 %v1427_v10  ;;  %v1234_v10 = vor.u32 %v1401_v4, %v1231_v5  ;;  %v1306_v23 = vor.u32 %v1419_v18, %v1303_v19  ;;  %v1311_v31 = vld [vmem:[%s1811_s19 + $0xe8] sm:$0xf0]  ;;  %v1250_v34 = vor.u32 %v1405_v28, %v1247_v29  ;;  %v1407_v40 = vld [vmem:[%s1811_s19 + $0x74] sm:$0xf]  ;;  %v1255_v41 = vld [vmem:[%s1811_s19 + $0x78] sm:$0xf0] }
  0x2a   : > { %741 = vmatpush.bf16.msra.mxu1 %v1435_v11  ;;  %1550 = vmatpush.bf16.msra.mxu3 %v1435_v11  ;;  %v1298_v11 = vor.u32 %v1417_v6, %v1295_v7  ;;  %v1314_v35 = vor.u32 %v1421_v30, %v1311_v31  ;;  %v1423_v42 = vld [vmem:[%s1811_s19 + $0xf4] sm:$0xf]  ;;  %v1319_v43 = vld [vmem:[%s1811_s19 + $0xf8] sm:$0xf0]  ;;  %v1258_v46 = vor.u32 %v1407_v40, %v1255_v41  ;;  %s1627_s21 = scalar_lea.hbm %s1626_s11, 128 }
  0x2b   : > { %v1322_v47 = vor.u32 %v1423_v42, %v1319_v43  ;;  %p1628_p12 = scmp.ne.s32.totalorder %s1626_s11, %s1627_s21  ;;  %p1633_p2 = scmp.lt.s32.totalorder %s1631_s27, %s1627_s21 }
  0x2d   : > { %653 = vmatpush.bf16.msra.mxu0 %v1426_v12  ;;  %1543 = vmatpush.bf16.msra.mxu2 %v1426_v12  ;;  %v1237_v12 = vld [vmem:[%s1811_s19 + $0x50] sm:$0xf]  ;;  %p1629_p13 = pnand %p1628_p12, %p1753_p4  ;;  %p1634_p3 = por %p1633_p2, %p1632_p1 }
  0x2e   : > { %742 = vmatpush.bf16.msra.mxu1 %v1434_v13  ;;  %1551 = vmatpush.bf16.msra.mxu3 %v1434_v13  ;;  %v1404_v13 = vld [vmem:[%s1811_s19 + $0x54] sm:$0xf0] }
  0x2f   : > { %v1238_v20 = vor.u32 %v1404_v13, %v1237_v12  ;;  %p1630_p0 = pneg %p1629_p13 }
  0x31   : > { %654 = vmatpush.bf16.msra.mxu0 %v1425_v14  ;;  %1544 = vmatpush.bf16.msra.mxu2 %v1425_v14  ;;  %v1301_v14 = vld [vmem:[%s1811_s19 + $0xd0] sm:$0xf]  ;;  %p1635_p5 = pnand %p1634_p3, %p1630_p0 }
  0x32   : > { %743 = vmatpush.bf16.msra.mxu1 %v1433_v15  ;;  %1552 = vmatpush.bf16.msra.mxu3 %v1433_v15  ;;  %v1420_v15 = vld [vmem:[%s1811_s19 + $0xd4] sm:$0xf0] }
  0x33   : > { %v1302_v21 = vor.u32 %v1420_v15, %v1301_v14 }
  0x34   : > { %655 = vmatmul.bf16.vlgmr.msra.gmra.mxu0 %v1198_v24  ;;  %695 = vmatmul.bf16.vlgmr.msra.gmra.mxu2 %v1262_v25  ;;  %v1245_v24 = vld [vmem:[%s1811_s19 + $0x60] sm:$0xf]  ;;  %v1406_v25 = vld [vmem:[%s1811_s19 + $0x64] sm:$0xf0] }
  0x35   : > { %744 = vmatmul.bf16.vlgmr.msra.gmra.mxu1 %v1202_v26  ;;  %784 = vmatmul.bf16.vlgmr.msra.gmra.mxu3 %v1266_v27  ;;  %v1309_v26 = vld [vmem:[%s1811_s19 + $0xe0] sm:$0xf]  ;;  %v1422_v27 = vld [vmem:[%s1811_s19 + $0xe4] sm:$0xf0]  ;;  %v1246_v32 = vor.u32 %v1406_v25, %v1245_v24 }
  0x36   : > { %v1310_v33 = vor.u32 %v1422_v27, %v1309_v26 }
  0x44   : > { %660 = vmatmul.bf16.gmra.mxu0 %v1206_v36  ;;  %700 = vmatmul.bf16.gmra.mxu2 %v1270_v37  ;;  %v1253_v36 = vld [vmem:[%s1811_s19 + $0x70] sm:$0xf]  ;;  %v1408_v37 = vld [vmem:[%s1811_s19 + $0x74] sm:$0xf0] }
  0x45   : > { %749 = vmatmul.bf16.gmra.mxu1 %v1210_v38  ;;  %789 = vmatmul.bf16.gmra.mxu3 %v1274_v39  ;;  %v1317_v38 = vld [vmem:[%s1811_s19 + $0xf0] sm:$0xf]  ;;  %v1424_v39 = vld [vmem:[%s1811_s19 + $0xf4] sm:$0xf0]  ;;  %v1254_v44 = vor.u32 %v1408_v37, %v1253_v36  ;;  %s1057_s19 = scalar_lea.sflag [#allocation4], %s231_s4 }
  0x46   : > { %v1318_v45 = vor.u32 %v1424_v39, %v1317_v38 }
  0x54   : > { %665 = vmatmul.bf16.gmra.mxu0 %v1214_v48  ;;  %705 = vmatmul.bf16.gmra.mxu2 %v1278_v49 }
  0x55   : > { %754 = vmatmul.bf16.gmra.mxu1 %v1218_v50  ;;  %794 = vmatmul.bf16.gmra.mxu3 %v1282_v51  ;;  %v1889_v51 = vld [vmem:[%s1985_s2] ss:$0 sm:$0xff] }
  0x64   : > { %670 = vmatmul.bf16.gmra.mxu0 %v1222_v60  ;;  %710 = vmatmul.bf16.gmra.mxu2 %v1286_v61 }
  0x65   : > { %759 = vmatmul.bf16.gmra.mxu1 %v1226_v62  ;;  %799 = vmatmul.bf16.gmra.mxu3 %v1290_v63 }
  0x74   : > { %675 = vmatmul.bf16.gmra.mxu0 %v1230_v8  ;;  %715 = vmatmul.bf16.gmra.mxu2 %v1294_v9 }
  0x75   : > { %764 = vmatmul.bf16.gmra.mxu1 %v1234_v10  ;;  %804 = vmatmul.bf16.gmra.mxu3 %v1298_v11 }
  0x84   : > { %680 = vmatmul.bf16.gmra.mxu0 %v1238_v20  ;;  %720 = vmatmul.bf16.gmra.mxu2 %v1302_v21 }
  0x85   : > { %769 = vmatmul.bf16.gmra.mxu1 %v1242_v22  ;;  %809 = vmatmul.bf16.gmra.mxu3 %v1306_v23 }
  0x94   : > { %685 = vmatmul.bf16.gmra.mxu0 %v1246_v32  ;;  %725 = vmatmul.bf16.gmra.mxu2 %v1310_v33 }
  0x95   : > { %774 = vmatmul.bf16.gmra.mxu1 %v1250_v34  ;;  %814 = vmatmul.bf16.gmra.mxu3 %v1314_v35 }
  0xa4   : > { %690 = vmatmul.bf16.gmra.mxu0 %v1254_v44  ;;  %730 = vmatmul.bf16.gmra.mxu2 %v1318_v45 }
  0xa5   : > { %779 = vmatmul.bf16.gmra.mxu1 %v1258_v46  ;;  %819 = vmatmul.bf16.gmra.mxu3 %v1322_v47 }
  0xb1   : > { %v656_v48 = vpop.f32.mrf.mxu0 }
  0xb2   : > { %v745_v49 = vpop.f32.mrf.mxu1 }
  0xb3   : > { %v746_v50 = vadd.f32 %v745_v49, %v656_v48 }
  0xb5   : > { %v928_v56 = vadd.f32 %v1889_v51, %v746_v50 }
  0xb7   : > { %v696_v52 = vpop.f32.mrf.mxu2  ;;  %v960_v60 = vmax.f32 %v928_v56, 0.0 }
  0xb8   : > { %v785_v53 = vpop.f32.mrf.mxu3 }
  0xb9   : > { %v658_v54 = vpop.f32.mrf.mxu0  ;;  %v786_v58 = vadd.f32 %v785_v53, %v696_v52 }
  0xba   : > { %v747_v55 = vpop.f32.mrf.mxu1 }
  0xbb   : > { %v748_v57 = vadd.f32 %v747_v55, %v658_v54  ;;  %v944_v0 = vadd.f32 %v1889_v51, %v786_v58 }
  0xbd   : > { %v929_v59 = vadd.f32 %v1889_v51, %v748_v57  ;;  %v976_v6 = vmax.f32 %v944_v0, 0.0 }
  0xbf   : > { %v961_v61 = vmax.f32 %v929_v59, 0.0  ;;  %v698_v62 = vpop.f32.mrf.mxu2 }
  0xc0   : > { %v787_v63 = vpop.f32.mrf.mxu3 }
  0xc1   : > { %v1445_v1 = vpack.c.bf16 %v961_v61, %v960_v60  ;;  %v788_v2 = vadd.f32 %v787_v63, %v698_v62  ;;  %v661_v3 = vpop.f32.mrf.mxu0 }
  0xc2   : > { %v750_v4 = vpop.f32.mrf.mxu1 }
  0xc3   : > { %1446 = vst [vmem:[%s1897_s6] sm:$0xff] %v1445_v1   ;;  %v945_v5 = vadd.f32 %v1889_v51, %v788_v2  ;;  %v751_v9 = vadd.f32 %v750_v4, %v661_v3 }
  0xc5   : > { %v977_v7 = vmax.f32 %v945_v5, 0.0  ;;  %v930_v14 = vadd.f32 %v1889_v51, %v751_v9 }
  0xc7   : > { %v1485_v8 = vpack.c.bf16 %v977_v7, %v976_v6  ;;  %v701_v10 = vpop.f32.mrf.mxu2  ;;  %v962_v18 = vmax.f32 %v930_v14, 0.0 }
  0xc8   : > { %v790_v11 = vpop.f32.mrf.mxu3 }
  0xc9   : > { %1529 = vst [vmem:[%s1897_s6 + $0x40] sm:$0xff] %v1485_v8   ;;  %v663_v12 = vpop.f32.mrf.mxu0  ;;  %v791_v16 = vadd.f32 %v790_v11, %v701_v10 }
  0xca   : > { %v752_v13 = vpop.f32.mrf.mxu1 }
  0xcb   : > { %v753_v15 = vadd.f32 %v752_v13, %v663_v12  ;;  %v946_v22 = vadd.f32 %v1889_v51, %v791_v16 }
  0xcd   : > { %v931_v17 = vadd.f32 %v1889_v51, %v753_v15  ;;  %v978_v28 = vmax.f32 %v946_v22, 0.0 }
  0xcf   : > { %v963_v19 = vmax.f32 %v931_v17, 0.0  ;;  %v703_v20 = vpop.f32.mrf.mxu2 }
  0xd0   : > { %v792_v21 = vpop.f32.mrf.mxu3 }
  0xd1   : > { %v1450_v23 = vpack.c.bf16 %v963_v19, %v962_v18  ;;  %v793_v24 = vadd.f32 %v792_v21, %v703_v20  ;;  %v666_v25 = vpop.f32.mrf.mxu0 }
  0xd2   : > { %v755_v26 = vpop.f32.mrf.mxu1 }
  0xd3   : > { %1522 = vst [vmem:[%s1897_s6 + $0x8] sm:$0xff] %v1450_v23   ;;  %v947_v27 = vadd.f32 %v1889_v51, %v793_v24  ;;  %v756_v31 = vadd.f32 %v755_v26, %v666_v25 }
  0xd5   : > { %v979_v29 = vmax.f32 %v947_v27, 0.0  ;;  %v932_v36 = vadd.f32 %v1889_v51, %v756_v31 }
  0xd7   : > { %v1490_v30 = vpack.c.bf16 %v979_v29, %v978_v28  ;;  %v706_v32 = vpop.f32.mrf.mxu2  ;;  %v964_v40 = vmax.f32 %v932_v36, 0.0 }
  0xd8   : > { %v795_v33 = vpop.f32.mrf.mxu3 }
  0xd9   : > { %1530 = vst [vmem:[%s1897_s6 + $0x48] sm:$0xff] %v1490_v30   ;;  %v668_v34 = vpop.f32.mrf.mxu0  ;;  %v796_v38 = vadd.f32 %v795_v33, %v706_v32 }
  0xda   : > { %v757_v35 = vpop.f32.mrf.mxu1 }
  0xdb   : > { %v758_v37 = vadd.f32 %v757_v35, %v668_v34  ;;  %v948_v44 = vadd.f32 %v1889_v51, %v796_v38 }
  0xdd   : > { %v933_v39 = vadd.f32 %v1889_v51, %v758_v37  ;;  %v980_v50 = vmax.f32 %v948_v44, 0.0 }
  0xdf   : > { %v965_v41 = vmax.f32 %v933_v39, 0.0  ;;  %v708_v42 = vpop.f32.mrf.mxu2 }
  0xe0   : > { %v797_v43 = vpop.f32.mrf.mxu3 }
  0xe1   : > { %v1455_v45 = vpack.c.bf16 %v965_v41, %v964_v40  ;;  %v798_v46 = vadd.f32 %v797_v43, %v708_v42  ;;  %v671_v47 = vpop.f32.mrf.mxu0 }
  0xe2   : > { %v760_v48 = vpop.f32.mrf.mxu1 }
  0xe3   : > { %1523 = vst [vmem:[%s1897_s6 + $0x10] sm:$0xff] %v1455_v45   ;;  %v949_v49 = vadd.f32 %v1889_v51, %v798_v46  ;;  %v761_v54 = vadd.f32 %v760_v48, %v671_v47 }
  0xe5   : > { %v981_v52 = vmax.f32 %v949_v49, 0.0  ;;  %v934_v59 = vadd.f32 %v1889_v51, %v761_v54 }
  0xe7   : > { %v1495_v53 = vpack.c.bf16 %v981_v52, %v980_v50  ;;  %v711_v55 = vpop.f32.mrf.mxu2  ;;  %v966_v63 = vmax.f32 %v934_v59, 0.0 }
  0xe8   : > { %v800_v56 = vpop.f32.mrf.mxu3 }
  0xe9   : > { %1531 = vst [vmem:[%s1897_s6 + $0x50] sm:$0xff] %v1495_v53   ;;  %v673_v57 = vpop.f32.mrf.mxu0  ;;  %v801_v61 = vadd.f32 %v800_v56, %v711_v55 }
  0xea   : > { %v762_v58 = vpop.f32.mrf.mxu1 }
  0xeb   : > { %v763_v60 = vadd.f32 %v762_v58, %v673_v57  ;;  %v950_v3 = vadd.f32 %v1889_v51, %v801_v61 }
  0xed   : > { %v935_v62 = vadd.f32 %v1889_v51, %v763_v60  ;;  %v982_v9 = vmax.f32 %v950_v3, 0.0 }
  0xef   : > { %v967_v0 = vmax.f32 %v935_v62, 0.0  ;;  %v713_v1 = vpop.f32.mrf.mxu2 }
  0xf0   : > { %v802_v2 = vpop.f32.mrf.mxu3 }
  0xf1   : > { %v1460_v4 = vpack.c.bf16 %v967_v0, %v966_v63  ;;  %v803_v5 = vadd.f32 %v802_v2, %v713_v1  ;;  %v676_v6 = vpop.f32.mrf.mxu0 }
  0xf2   : > { %v765_v7 = vpop.f32.mrf.mxu1 }
  0xf3   : > { %1524 = vst [vmem:[%s1897_s6 + $0x18] sm:$0xff] %v1460_v4   ;;  %v951_v8 = vadd.f32 %v1889_v51, %v803_v5  ;;  %v766_v12 = vadd.f32 %v765_v7, %v676_v6 }
  0xf5   : > { %v983_v10 = vmax.f32 %v951_v8, 0.0  ;;  %v936_v17 = vadd.f32 %v1889_v51, %v766_v12 }
  0xf7   : > { %v1500_v11 = vpack.c.bf16 %v983_v10, %v982_v9  ;;  %v716_v13 = vpop.f32.mrf.mxu2  ;;  %v968_v21 = vmax.f32 %v936_v17, 0.0 }
  0xf8   : > { %v805_v14 = vpop.f32.mrf.mxu3 }
  0xf9   : > { %1532 = vst [vmem:[%s1897_s6 + $0x58] sm:$0xff] %v1500_v11   ;;  %v678_v15 = vpop.f32.mrf.mxu0  ;;  %v806_v19 = vadd.f32 %v805_v14, %v716_v13 }
  0xfa   : > { %v767_v16 = vpop.f32.mrf.mxu1 }
  0xfb   : > { %v768_v18 = vadd.f32 %v767_v16, %v678_v15  ;;  %v952_v25 = vadd.f32 %v1889_v51, %v806_v19 }
  0xfd   : > { %v937_v20 = vadd.f32 %v1889_v51, %v768_v18  ;;  %v984_v31 = vmax.f32 %v952_v25, 0.0 }
  0xff   : > { %v969_v22 = vmax.f32 %v937_v20, 0.0  ;;  %v718_v23 = vpop.f32.mrf.mxu2 }
 0x100   : > { %v807_v24 = vpop.f32.mrf.mxu3 }
 0x101   : > { %v1465_v26 = vpack.c.bf16 %v969_v22, %v968_v21  ;;  %v808_v27 = vadd.f32 %v807_v24, %v718_v23  ;;  %v681_v28 = vpop.f32.mrf.mxu0 }
 0x102   : > { %v770_v29 = vpop.f32.mrf.mxu1 }
 0x103   : > { %1525 = vst [vmem:[%s1897_s6 + $0x20] sm:$0xff] %v1465_v26   ;;  %v953_v30 = vadd.f32 %v1889_v51, %v808_v27  ;;  %v771_v34 = vadd.f32 %v770_v29, %v681_v28 }
 0x105   : > { %v985_v32 = vmax.f32 %v953_v30, 0.0  ;;  %v938_v39 = vadd.f32 %v1889_v51, %v771_v34 }
 0x107   : > { %v1505_v33 = vpack.c.bf16 %v985_v32, %v984_v31  ;;  %v721_v35 = vpop.f32.mrf.mxu2  ;;  %v970_v43 = vmax.f32 %v938_v39, 0.0 }
 0x108   : > { %v810_v36 = vpop.f32.mrf.mxu3 }
 0x109   : > { %1533 = vst [vmem:[%s1897_s6 + $0x60] sm:$0xff] %v1505_v33   ;;  %v683_v37 = vpop.f32.mrf.mxu0  ;;  %v811_v41 = vadd.f32 %v810_v36, %v721_v35 }
 0x10a   : > { %v772_v38 = vpop.f32.mrf.mxu1 }
 0x10b   : > { %v773_v40 = vadd.f32 %v772_v38, %v683_v37  ;;  %v954_v47 = vadd.f32 %v1889_v51, %v811_v41 }
 0x10d   : > { %v939_v42 = vadd.f32 %v1889_v51, %v773_v40  ;;  %v986_v54 = vmax.f32 %v954_v47, 0.0 }
 0x10f   : > { %v971_v44 = vmax.f32 %v939_v42, 0.0  ;;  %v723_v45 = vpop.f32.mrf.mxu2 }
 0x110   : > { %v812_v46 = vpop.f32.mrf.mxu3 }
 0x111   : > { %v1470_v48 = vpack.c.bf16 %v971_v44, %v970_v43  ;;  %v813_v49 = vadd.f32 %v812_v46, %v723_v45  ;;  %v686_v50 = vpop.f32.mrf.mxu0 }
 0x112   : > { %v775_v52 = vpop.f32.mrf.mxu1 }
 0x113   : > { %1526 = vst [vmem:[%s1897_s6 + $0x28] sm:$0xff] %v1470_v48   ;;  %v955_v53 = vadd.f32 %v1889_v51, %v813_v49  ;;  %v776_v57 = vadd.f32 %v775_v52, %v686_v50 }
 0x115   : > { %v987_v55 = vmax.f32 %v955_v53, 0.0  ;;  %v940_v62 = vadd.f32 %v1889_v51, %v776_v57 }
 0x117   : > { %v1510_v56 = vpack.c.bf16 %v987_v55, %v986_v54  ;;  %v726_v58 = vpop.f32.mrf.mxu2  ;;  %v972_v2 = vmax.f32 %v940_v62, 0.0 }
 0x118   : > { %v815_v59 = vpop.f32.mrf.mxu3 }
 0x119   : > { %1534 = vst [vmem:[%s1897_s6 + $0x68] sm:$0xff] %v1510_v56   ;;  %v688_v60 = vpop.f32.mrf.mxu0  ;;  %v816_v0 = vadd.f32 %v815_v59, %v726_v58 }
 0x11a   : > { %v777_v61 = vpop.f32.mrf.mxu1 }
 0x11b   : > { %v778_v63 = vadd.f32 %v777_v61, %v688_v60  ;;  %v956_v6 = vadd.f32 %v1889_v51, %v816_v0 }
 0x11d   : > { %v941_v1 = vadd.f32 %v1889_v51, %v778_v63  ;;  %v988_v12 = vmax.f32 %v956_v6, 0.0 }
 0x11f   : > { %v973_v3 = vmax.f32 %v941_v1, 0.0  ;;  %v728_v4 = vpop.f32.mrf.mxu2 }
 0x120   : > { %v817_v5 = vpop.f32.mrf.mxu3 }
 0x121   : > { %v1475_v7 = vpack.c.bf16 %v973_v3, %v972_v2  ;;  %v818_v8 = vadd.f32 %v817_v5, %v728_v4  ;;  %v691_v9 = vpop.f32.mrf.mxu0 }
 0x122   : > { %v780_v10 = vpop.f32.mrf.mxu1 }
 0x123   : > { %1527 = vst [vmem:[%s1897_s6 + $0x30] sm:$0xff] %v1475_v7   ;;  %v957_v11 = vadd.f32 %v1889_v51, %v818_v8  ;;  %v781_v15 = vadd.f32 %v780_v10, %v691_v9 }
 0x125   : > { %v989_v13 = vmax.f32 %v957_v11, 0.0  ;;  %v942_v20 = vadd.f32 %v1889_v51, %v781_v15 }
 0x127   : > { %v1515_v14 = vpack.c.bf16 %v989_v13, %v988_v12  ;;  %v731_v16 = vpop.f32.mrf.mxu2  ;;  %v974_v24 = vmax.f32 %v942_v20, 0.0 }
 0x128   : > { %v820_v17 = vpop.f32.mrf.mxu3 }
 0x129   : > { %1535 = vst [vmem:[%s1897_s6 + $0x70] sm:$0xff] %v1515_v14   ;;  %v693_v18 = vpop.f32.mrf.mxu0  ;;  %v821_v22 = vadd.f32 %v820_v17, %v731_v16 }
 0x12a   : > { %v782_v19 = vpop.f32.mrf.mxu1 }
 0x12b   : > { %v783_v21 = vadd.f32 %v782_v19, %v693_v18  ;;  %v958_v28 = vadd.f32 %v1889_v51, %v821_v22 }
 0x12d   : > { %v943_v23 = vadd.f32 %v1889_v51, %v783_v21  ;;  %v990_v32 = vmax.f32 %v958_v28, 0.0 }
 0x12f   : > { %v975_v25 = vmax.f32 %v943_v23, 0.0  ;;  %v733_v26 = vpop.f32.mrf.mxu2 }
 0x130   : > { %v822_v27 = vpop.f32.mrf.mxu3 }
 0x131   : > { %v1480_v29 = vpack.c.bf16 %v975_v25, %v974_v24  ;;  %v823_v30 = vadd.f32 %v822_v27, %v733_v26 }
 0x133   : > { %1528 = vst [vmem:[%s1897_s6 + $0x38] sm:$0xff] %v1480_v29   ;;  %v959_v31 = vadd.f32 %v1889_v51, %v823_v30 }
 0x135   : > { %v991_v33 = vmax.f32 %v959_v31, 0.0 }
 0x137   : > { %v1520_v34 = vpack.c.bf16 %v991_v33, %v990_v32 }
 0x139   : > { %1536 = vst [vmem:[%s1897_s6 + $0x78] sm:$0xff] %v1520_v34  }
 0x13a   : > { %1638 = shalt.err (!%p1635_p5)
}
 0x13b   : > { %s1691_s30 = smov 64   ;;  %s1692_s4 = smov 4  }
 0x13c   : > { %1553 = dma.vmem_to_hbm [thread:$0]  (%p1753_p4), %s1071_s18, 2048, %s1073_s15, %s1057_s19, %s1691_s30, %s1691_s30, %s1692_s4  }
 0x13d PF: > { %p1559_p6 = scmp.ge.s32.totalorder %s1689_s17, 2  ;;  %s1087_s5 = sand.u32 1, %s1669_s12  }
 0x13e   : > { %s1088_s6 = scalar_lea.sflag [#allocation4], %s1087_s5 }
 0x13f   : > { %p1556_p7 = pnand %p1559_p6, %p1760_p8 }
 0x141   : > { %p1557_p9 = pneg %p1556_p7 }
 0x143   : > { %1664 = dma.done.wait (%p1557_p9), %s1088_s6, 2048  }
 0x144   : > { %1666 = vsyncadd (%p1557_p9), %s1088_s6, 4294965248  ;;  %s16_s17 = sadd.s32 1, %s1689_s17   ;;  %s1989_s12 = smov %s1673_s13 }
 0x145   : > { %p13_p10 = scmp.ge.s32.totalorder %s16_s17, 4   ;;  %s1990_s13 = smov %s1677_s14 }
 0x146   : > { %s1991_s14 = smov %s1766_s25  ;;  %s1992_s15 = smov %s1685_s16 }
 0x147   : > { %s1993_s16 = smov %s1995_s20  ;;  %15 = sbr.rel (!%p13_p10) target bundleno = 4 (0x4), region = 81 }
 0x14c   :  { %1094 = vsyncpa [#allocation4], 1 }
 0x14d   :  { %1096 = vsyncpa [#allocation4 + $0x1], 1 }

</bundles_post_ra>
